<compile_context>
chip_gen: v7x
topology: tpu7x:2x2x1
jax: 0.10.0
libtpu: 0.0.40
codegen_flags: <defaults>
</compile_context>

<pallas_src>
import jax
import jax.numpy as jnp
from jax import lax
from jax.experimental import pallas as pl
from jax.experimental.pallas import tpu as pltpu


def _round_down(n, m):
    return (n // m) * m


def _round_up(n, m):
    return ((n + m - 1) // m) * m


def _pick_batch_tile(B, D, itemsize):
    # Target a ~2 MiB x tile (double-buffered -> ~4 MiB VMEM; weight/bias/out
    # tiles are tiny), comfortably inside every generation's default scoped
    # VMEM (16 MiB on v5e, 32 MiB on v6e/v7x).
    tb = _round_down((2 * 1024 * 1024) // max(D * itemsize, 1), 128)
    tb = max(128, min(8192, tb))
    # Don't tile far beyond the actual batch.
    tb = min(tb, _round_up(B, 128))
    # v7x: "parallel" only pays off with >= 2 grid steps; halve the tile for
    # smallish batches so both TensorCores get (balanced) work.
    half = _round_down(_round_up(B, 128) // 2, 128)
    if half >= 128:
        tb = min(tb, half)
    return tb


def gating_kernel(x_ref, w1_ref, b1_ref, w2_ref, b2_ref, ot_ref):
    # Feature-major: the batch tile is on the 128-lane axis everywhere below.
    x = x_ref[...]          # (TB, D), native dtype (f32 or bf16)
    w1 = w1_ref[...]        # (H, D)  nn.Linear layout (out_features, in_features)
    w2 = w2_ref[...]        # (E, H)

    # h^T = ReLU(w1 @ x^T + b1) -> (H, TB); MXU with f32 accumulation.
    h = lax.dot_general(w1, x, (((1,), (1,)), ((), ())),
                        preferred_element_type=jnp.float32)
    h = jnp.maximum(h + b1_ref[...], 0.0)

    # logits^T = w2 @ h^T + b2 -> (E, TB)
    logits = jnp.dot(w2, h, preferred_element_type=jnp.float32) + b2_ref[...]

    # Numerically stable softmax over the expert axis (axis 0 in this layout),
    # with an exact divide so each column sums to 1 within f32 rounding.
    m = jnp.max(logits, axis=0, keepdims=True)
    e = jnp.exp(logits - m)
    denom = jnp.sum(e, axis=0, keepdims=True)
    ot_ref[...] = (e / denom).astype(ot_ref.dtype)


def gating_net(x, w1, b1, w2, b2, *, tb=None):
    """Fused GatingNet forward.

    x : (B, D)  activations (f32 or bf16)
    w1: (H, D)  first Linear weight in nn.Linear layout (out_features, in_features)
    b1: (H,)    first Linear bias
    w2: (E, H)  second Linear weight in nn.Linear layout
    b2: (E,)    second Linear bias
    returns (B, E) softmax gating probabilities (f32).
    """
    B, D = x.shape
    H, D1 = w1.shape
    E, H1 = w2.shape
    assert D1 == D and H1 == H and b1.shape == (H,) and b2.shape == (E,), (
        "weights must be in nn.Linear (out_features, in_features) layout; "
        f"got x{x.shape} w1{w1.shape} b1{b1.shape} w2{w2.shape} b2{b2.shape}"
    )

    b1c = b1.reshape(H, 1).astype(jnp.float32)
    b2c = b2.reshape(E, 1).astype(jnp.float32)

    if tb is None:
        tb = _pick_batch_tile(B, D, x.dtype.itemsize)

    grid = (pl.cdiv(B, tb),)  # ragged last block handled by Pallas (masked writes)

    cost = pl.CostEstimate(
        flops=2 * B * (D * H + H * E),
        transcendentals=B * E,
        bytes_accessed=int(x.dtype.itemsize) * B * D + 4 * B * E
        + 4 * (H * D + H + E * H + E),
    )

    out_t = pl.pallas_call(
        gating_kernel,
        out_shape=jax.ShapeDtypeStruct((E, B), jnp.float32),
        grid=grid,
        in_specs=[
            # streamed activation tiles (pipelined HBM->VMEM)
            pl.BlockSpec((tb, D), lambda i: (i, 0)),
            # weights/biases: constant index maps -> VMEM-resident across steps
            pl.BlockSpec((H, D), lambda i: (0, 0)),
            pl.BlockSpec((H, 1), lambda i: (0, 0)),
            pl.BlockSpec((E, H), lambda i: (0, 0)),
            pl.BlockSpec((E, 1), lambda i: (0, 0)),
        ],
        # transposed output block: batch on the lane axis -> lane-dense stores
        out_specs=pl.BlockSpec((E, tb), lambda i: (0, i)),
        compiler_params=pltpu.CompilerParams(
            # independent batch tiles: shard grid steps across both TensorCores
            # on v7x; no-op on single-TC v5e/v6e.
            dimension_semantics=("parallel",),
        ),
        cost_estimate=cost,
    )(x, w1, b1c, w2, b2c)

    # Tiny (E, B) -> (B, E) transpose in plain XLA.
    return out_t.T


def init_params(key, input_dim, num_experts, hidden=64):
    """Deterministic synthetic init mirroring nn.Linear's U(-1/sqrt(fan_in), .)."""
    k1, k2, k3, k4 = jax.random.split(key, 4)
    lim1 = 1.0 / jnp.sqrt(jnp.float32(input_dim))
    lim2 = 1.0 / jnp.sqrt(jnp.float32(hidden))
    w1 = jax.random.uniform(k1, (hidden, input_dim), jnp.float32, -lim1, lim1)
    b1 = jax.random.uniform(k2, (hidden,), jnp.float32, -lim1, lim1)
    w2 = jax.random.uniform(k3, (num_experts, hidden), jnp.float32, -lim2, lim2)
    b2 = jax.random.uniform(k4, (num_experts,), jnp.float32, -lim2, lim2)
    return w1, b1, w2, b2


if __name__ == "__main__":
    key = jax.random.PRNGKey(0)
    k_x, k_p = jax.random.split(key)

    batch, input_dim, num_experts = 8, 32, 4
    x = jax.random.normal(k_x, (batch, input_dim), jnp.float32)
    w1, b1, w2, b2 = init_params(k_p, input_dim, num_experts)

    out = jax.block_until_ready(gating_net(x, w1, b1, w2, b2))

    # Plain-JAX reference (nn.Linear semantics: x @ W^T + b).
    h_ref = jnp.maximum(x @ w1.T + b1, 0.0)
    ref = jax.nn.softmax(h_ref @ w2.T + b2, axis=1)

    assert out.shape == (batch, num_experts)
    assert jnp.allclose(out, ref, atol=2e-3, rtol=2e-3), float(
        jnp.max(jnp.abs(out - ref))
    )
    # Exact divide in-kernel -> rows sum to 1 within f32 rounding.
    assert jnp.allclose(jnp.sum(out, axis=1), 1.0, atol=1e-4)

    print("KERNEL_OK")
</pallas_src>

<mosaic_0001>
module attributes {stable_mosaic.version = 11 : i64} {
  func.func @gating_kernel(%arg0: i32, %arg1: memref<128x32xf32, #tpu.memory_space<vmem>>, %arg2: memref<64x32xf32, #tpu.memory_space<vmem>>, %arg3: memref<64x1xf32, #tpu.memory_space<vmem>>, %arg4: memref<4x64xf32, #tpu.memory_space<vmem>>, %arg5: memref<4x1xf32, #tpu.memory_space<vmem>>, %arg6: memref<4x128xf32, #tpu.memory_space<vmem>>) attributes {dimension_semantics = [#tpu.dimension_semantics<parallel>], iteration_bounds = array<i64: 1>, scalar_prefetch = 0 : i64, scratch_operands = 0 : i64, tpu.core_type = #tpu.core_type<tc>, window_params = [{transform_indices = @transform_0, window_bounds = array<i64: 128, 32>}, {pipeline_mode = #tpu.pipeline_mode<synchronous>, transform_indices = @transform_1, window_bounds = array<i64: 64, 32>}, {pipeline_mode = #tpu.pipeline_mode<synchronous>, transform_indices = @transform_2, window_bounds = array<i64: 64, 1>}, {pipeline_mode = #tpu.pipeline_mode<synchronous>, transform_indices = @transform_3, window_bounds = array<i64: 4, 64>}, {pipeline_mode = #tpu.pipeline_mode<synchronous>, transform_indices = @transform_4, window_bounds = array<i64: 4, 1>}, {transform_indices = @transform_5, window_bounds = array<i64: 4, 128>}]} {
    %c0 = arith.constant 0 : index
    %c0_0 = arith.constant 0 : index
    %0 = vector.load %arg1[%c0, %c0_0] : memref<128x32xf32, #tpu.memory_space<vmem>>, vector<128x32xf32>
    %c0_1 = arith.constant 0 : index
    %c0_2 = arith.constant 0 : index
    %1 = vector.load %arg2[%c0_1, %c0_2] : memref<64x32xf32, #tpu.memory_space<vmem>>, vector<64x32xf32>
    %c0_3 = arith.constant 0 : index
    %c0_4 = arith.constant 0 : index
    %2 = vector.load %arg4[%c0_3, %c0_4] : memref<4x64xf32, #tpu.memory_space<vmem>>, vector<4x64xf32>
    %cst = arith.constant dense<0.000000e+00> : vector<64x128xf32>
    %3 = tpu.matmul %1, %0, %cst {dimension_numbers = #tpu.dot_dimension_numbers<[1], [1], [0], [0], [0, 0, 1, 0], [], []>} : vector<64x32xf32>, vector<128x32xf32>, vector<64x128xf32> -> vector<64x128xf32>
    %c0_5 = arith.constant 0 : index
    %c0_6 = arith.constant 0 : index
    %4 = vector.load %arg3[%c0_5, %c0_6] : memref<64x1xf32, #tpu.memory_space<vmem>>, vector<64x1xf32>
    %5 = vector.broadcast %4 : vector<64x1xf32> to vector<64x128xf32>
    %6 = arith.addf %3, %5 : vector<64x128xf32>
    %cst_7 = arith.constant 0.000000e+00 : f32
    %7 = vector.broadcast %cst_7 : f32 to vector<64x128xf32>
    %8 = arith.maximumf %6, %7 : vector<64x128xf32>
    %cst_8 = arith.constant dense<0.000000e+00> : vector<4x128xf32>
    %9 = tpu.matmul %2, %8, %cst_8 {dimension_numbers = #tpu.dot_dimension_numbers<[1], [0], [0], [1], [0, 0, 1, 1], [], []>} : vector<4x64xf32>, vector<64x128xf32>, vector<4x128xf32> -> vector<4x128xf32>
    %c0_9 = arith.constant 0 : index
    %c0_10 = arith.constant 0 : index
    %10 = vector.load %arg5[%c0_9, %c0_10] : memref<4x1xf32, #tpu.memory_space<vmem>>, vector<4x1xf32>
    %11 = vector.broadcast %10 : vector<4x1xf32> to vector<4x128xf32>
    %12 = arith.addf %9, %11 : vector<4x128xf32>
    %cst_11 = arith.constant dense<0xFF800000> : vector<128xf32>
    %13 = vector.multi_reduction <maximumf>, %12, %cst_11 [0] : vector<4x128xf32> to vector<128xf32>
    %14 = vector.shape_cast %13 : vector<128xf32> to vector<1x128xf32>
    %15 = vector.broadcast %14 : vector<1x128xf32> to vector<4x128xf32>
    %16 = arith.subf %12, %15 : vector<4x128xf32>
    %17 = math.exp %16 : vector<4x128xf32>
    %cst_12 = arith.constant dense<0.000000e+00> : vector<128xf32>
    %18 = vector.multi_reduction <add>, %17, %cst_12 [0] : vector<4x128xf32> to vector<128xf32>
    %19 = vector.shape_cast %18 : vector<128xf32> to vector<1x128xf32>
    %20 = vector.broadcast %19 : vector<1x128xf32> to vector<4x128xf32>
    %21 = arith.divf %17, %20 : vector<4x128xf32>
    %c0_13 = arith.constant 0 : index
    %c0_14 = arith.constant 0 : index
    %22 = vector.load %arg6[%c0_13, %c0_14] : memref<4x128xf32, #tpu.memory_space<vmem>>, vector<4x128xf32>
    tpu.vector_store %arg6[%c0_13, %c0_14], %21 {strides = array<i32>} : memref<4x128xf32, #tpu.memory_space<vmem>>, vector<4x128xf32>,
    return
  }
  func.func @transform_0(%arg0: i32) -> (i32, i32) {
    %c0_i32 = arith.constant 0 : i32
    %c0_i32_0 = arith.constant 0 : i32
    return %arg0, %c0_i32 : i32, i32
  }
  func.func @transform_1(%arg0: i32) -> (i32, i32) {
    %c0_i32 = arith.constant 0 : i32
    %c0_i32_0 = arith.constant 0 : i32
    %c0_i32_1 = arith.constant 0 : i32
    return %c0_i32, %c0_i32_0 : i32, i32
  }
  func.func @transform_2(%arg0: i32) -> (i32, i32) {
    %c0_i32 = arith.constant 0 : i32
    %c0_i32_0 = arith.constant 0 : i32
    %c0_i32_1 = arith.constant 0 : i32
    return %c0_i32, %c0_i32_0 : i32, i32
  }
  func.func @transform_3(%arg0: i32) -> (i32, i32) {
    %c0_i32 = arith.constant 0 : i32
    %c0_i32_0 = arith.constant 0 : i32
    %c0_i32_1 = arith.constant 0 : i32
    return %c0_i32, %c0_i32_0 : i32, i32
  }
  func.func @transform_4(%arg0: i32) -> (i32, i32) {
    %c0_i32 = arith.constant 0 : i32
    %c0_i32_0 = arith.constant 0 : i32
    %c0_i32_1 = arith.constant 0 : i32
    return %c0_i32, %c0_i32_0 : i32, i32
  }
  func.func @transform_5(%arg0: i32) -> (i32, i32) {
    %c0_i32 = arith.constant 0 : i32
    %c0_i32_0 = arith.constant 0 : i32
    return %c0_i32, %arg0 : i32, i32
  }
}

</mosaic_0001>

<bundles_post_ra>
// kernel: tpu_custom_call.1
= control target key start
LH: loop header
LB: loop body
LE: loop exit
PB: predicated region body
PF: predicated region fallthrough
CT: control target
= control target key end

     0   :  { %vm94_vm0 = vcmask 261120   ;;  %v611_v6 = vmov 0   ;;  %s806_s0 = inlined_call_operand.vmem [shape: f32[8,32], index: 0, kind: input, shape index: {}]   ;;  %s807_s1 = inlined_call_operand.vmem [shape: f32[64,32], index: 1, kind: input, shape index: {}]   ;;  %s808_s2 = inlined_call_operand.vmem [shape: f32[64,1], index: 2, kind: input, shape index: {}]   ;;  %s809_s3 = inlined_call_operand.vmem [shape: f32[4,64], index: 3, kind: input, shape index: {}]   ;;  %s810_s4 = inlined_call_operand.vmem [shape: f32[4,1], index: 4, kind: input, shape index: {}]   ;;  %s811_s5 = inlined_call_operand.hbm [shape: f32[4,8], index: 5, kind: output, shape index: {}]  }
   0x1   :  { %v21_v0 = vld [vmem:[%s806_s0] sm:$0xff]  ;;  %v22_v1 = vld [vmem:[%s806_s0 + $0x8] sm:$0xff]  ;;  %v23_v2 = vld [vmem:[%s806_s0 + $0x10] sm:$0xff]  ;;  %581 = vset.pattern.permute.xlu0 %v611_v6  ;;  %582 = vset.pattern.permute.xlu1 %v611_v6 }
   0x2   :  { %v516_v3 = vpack.c.bf16 %v22_v1, %v21_v0  ;;  %vm657_vm1 = vmpackc.low %vm94_vm0, %vm94_vm0  ;;  %v24_v5 = vld [vmem:[%s806_s0 + $0x18] sm:$0xff]  ;;  %v37_v8 = vld [vmem:[%s807_s1] sm:$0xff] }
   0x3   :  { %v522_v7 = vpack.c.bf16 %v24_v5, %v23_v2  ;;  %v25_v9 = vld [vmem:[%s806_s0 + $0x20] sm:$0xff]  ;;  %v26_v10 = vld [vmem:[%s806_s0 + $0x28] sm:$0xff]  ;;  %485 = vmatprep.mubr.msk.f32.mxu0 %vm94_vm0, %v37_v8  ;;  %v48_v13 = vld [vmem:[%s808_s2 + $0x10] sm:$0xff] }
   0x4   :  { %518 = vmatprep.subr.msk.bf16.mxu0 %vm657_vm1, %v516_v3  ;;  %v46_v11 = vld [vmem:[%s808_s2] sm:$0xff]  ;;  %v528_v12 = vpack.c.bf16 %v26_v10, %v25_v9  ;;  %v47_v14 = vld [vmem:[%s808_s2 + $0x8] sm:$0xff]  ;;  %66 = vperm.xlu1 %582, %v48_v13   ;;  %v49_v15 = vld [vmem:[%s808_s2 + $0x18] sm:$0xff] }
   0x5   :  { %521 = vmatpush3.bf16.xpose.msk.msra.mxu0 %vm657_vm1, %v516_v3  ;;  %56 = vperm.xlu0 %581, %v46_v11  }
   0x6   :  { %524 = vmatprep.subr.msk.bf16.mxu0 %vm657_vm1, %v522_v7 }
   0x7   :  { %10 = vsyncpa [#allocation3], 0  ;;  %v27_v16 = vld [vmem:[%s806_s0 + $0x30] sm:$0xff]  ;;  %v28_v17 = vld [vmem:[%s806_s0 + $0x38] sm:$0xff]  ;;  %v612_v43 = vmov 0.0|0.0   ;;  %vm613_vm2 = vmmov 0  }
   0x8   :  { %v50_v18 = vld [vmem:[%s808_s2 + $0x20] sm:$0xff]  ;;  %71 = vperm.xlu1 %582, %v49_v15   ;;  %v51_v19 = vld [vmem:[%s808_s2 + $0x28] sm:$0xff]  ;;  %v534_v20 = vpack.c.bf16 %v28_v17, %v27_v16  ;;  %v52_v21 = vld [vmem:[%s808_s2 + $0x30] sm:$0xff]  ;;  %564 = vmatprep.subr.bf16.mxu1 %v612_v43  ;;  %v614_v44 = vmov 0.0   ;;  %vm286_vm3 = vcmask 523264   ;;  %vm360_vm4 = vcmask 1043456  }
   0x9   :  { %61 = vperm.xlu0 %581, %v47_v14   ;;  %v53_v22 = vld [vmem:[%s808_s2 + $0x38] sm:$0xff]  ;;  %v29_v23 = vld [vmem:[%s806_s0 + $0x40] sm:$0xff]  ;;  %v30_v24 = vld [vmem:[%s806_s0 + $0x48] sm:$0xff]  ;;  %513 = vmatprep.mubr.msk.f32.mxu1 %vm613_vm2, %v614_v44 }
   0xa   :  { %v280_v25 = vld [vmem:[%s810_s4] sm:$0xf]  ;;  %v540_v26 = vpack.c.bf16 %v30_v24, %v29_v23  ;;  %v31_v27 = vld [vmem:[%s806_s0 + $0x50] sm:$0xff]  ;;  %v32_v28 = vld [vmem:[%s806_s0 + $0x58] sm:$0xff] }
   0xb   :  { %v546_v29 = vpack.c.bf16 %v32_v28, %v31_v27  ;;  %v33_v30 = vld [vmem:[%s806_s0 + $0x60] sm:$0xff]  ;;  %v34_v31 = vld [vmem:[%s806_s0 + $0x68] sm:$0xff]  ;;  %v35_v33 = vld [vmem:[%s806_s0 + $0x70] sm:$0xff] }
   0xc   :  { %81 = vperm.xlu1 %582, %v51_v19   ;;  %v552_v32 = vpack.c.bf16 %v34_v31, %v33_v30  ;;  %v36_v34 = vld [vmem:[%s806_s0 + $0x78] sm:$0xff]  ;;  %v38_v36 = vld [vmem:[%s807_s1 + $0x8] sm:$0xff]  ;;  %v39_v37 = vld [vmem:[%s807_s1 + $0x10] sm:$0xff] }
   0xd   :  { %527 = vmatpush3.bf16.xpose.msk.msra.mxu0 %vm657_vm1, %v522_v7  ;;  %76 = vperm.xlu0 %581, %v50_v18   ;;  %v558_v35 = vpack.c.bf16 %v36_v34, %v35_v33  ;;  %v40_v38 = vld [vmem:[%s807_s1 + $0x18] sm:$0xff]  ;;  %v41_v39 = vld [vmem:[%s807_s1 + $0x20] sm:$0xff]  ;;  %v42_v40 = vld [vmem:[%s807_s1 + $0x28] sm:$0xff] }
   0xe   :  { %530 = vmatprep.subr.msk.bf16.mxu0 %vm657_vm1, %v528_v12  ;;  %v43_v41 = vld [vmem:[%s807_s1 + $0x30] sm:$0xff]  ;;  %v44_v42 = vld [vmem:[%s807_s1 + $0x38] sm:$0xff]  ;;  %v45_v17 = vld [vmem:[%s809_s3] sm:$0xf]  ;;  %s615_s3 = smov [#allocation2]  }
   0xf   :  { %s387_s7 = sshll.u32 %s615_s3, 4  ;;  %s388_s7 = int_to_ptr.vmem [resolvable:$true] %s387_s7 }
  0x10   :  { %91 = vperm.xlu1 %582, %v53_v22   ;;  %s587_s2 = scalar_lea.vmem %s388_s7, 64  ;;  %p592_p1 = scmp.lt.s32.totalorder %s388_s7, %s388_s7 }
  0x11   :  { %86 = vperm.xlu0 %581, %v52_v21   ;;  %p588_p0 = scmp.ne.s32.totalorder %s388_s7, %s587_s2  ;;  %p593_p2 = scmp.lt.s32.totalorder %s587_s2, %s587_s2 }
  0x13   :  { %p594_p3 = por %p593_p2, %p592_p1 }
  0x15   :  { %533 = vmatpush3.bf16.xpose.msk.msra.mxu0 %vm657_vm1, %v528_v12  ;;  %283 = vperm.xlu0 %581, %v280_v25   ;;  %p595_p4 = pnand %p594_p3, %p588_p0 }
  0x16   :  { %536 = vmatprep.subr.msk.bf16.mxu0 %vm657_vm1, %v534_v20 }
  0x1d   :  { %539 = vmatpush3.bf16.xpose.msk.msra.mxu0 %vm657_vm1, %v534_v20 }
  0x1e   :  { %542 = vmatprep.subr.msk.bf16.mxu0 %vm657_vm1, %v540_v26 }
  0x25   :  { %545 = vmatpush3.bf16.xpose.msk.msra.mxu0 %vm657_vm1, %v540_v26 }
  0x26   :  { %548 = vmatprep.subr.msk.bf16.mxu0 %vm657_vm1, %v546_v29 }
  0x2d   :  { %551 = vmatpush3.bf16.xpose.msk.msra.mxu0 %vm657_vm1, %v546_v29 }
  0x2e   :  { %554 = vmatprep.subr.msk.bf16.mxu0 %vm657_vm1, %v552_v32 }
  0x35   :  { %557 = vmatpush3.bf16.xpose.msk.msra.mxu0 %vm657_vm1, %v552_v32 }
  0x36   :  { %560 = vmatprep.subr.msk.bf16.mxu0 %vm657_vm1, %v558_v35 }
  0x3d   :  { %563 = vmatpush3.bf16.xpose.msk.msra.mxu0 %vm657_vm1, %v558_v35 }
  0x44   :  { %486 = vmatmul.mubr.msk.f32.vlgmr.msra.gmra.mrb[0].mxu0 %vm94_vm0, %v38_v36 }
  0x45   :  { %488 = vmatprep.mubr.msk.f32.mxu0 %vm94_vm0, %v39_v37 }
  0x48   :  { %489 = vmatmul.mubr.msk.f32.gmra.mrb[2].mxu0 %vm94_vm0, %v40_v38 }
  0x49   :  { %491 = vmatprep.mubr.msk.f32.mxu0 %vm94_vm0, %v41_v39 }
  0x4c   :  { %492 = vmatmul.mubr.msk.f32.gmra.mrb[4].mxu0 %vm94_vm0, %v42_v40 }
  0x4d   :  { %494 = vmatprep.mubr.msk.f32.mxu0 %vm94_vm0, %v43_v41 }
  0x50   :  { %495 = vmatmul.mubr.msk.f32.gmra.mrb[6].mxu0 %vm94_vm0, %v44_v42 }
  0x83   :  { %v67_v46 = vpop.permute.xlu1 %66 }
  0x84   :  { %v57_v45 = vpop.permute.xlu0 %56 }
  0x87   :  { %v72_v48 = vpop.permute.xlu1 %71 }
  0x88   :  { %v62_v47 = vpop.permute.xlu0 %61 }
  0x8b   :  { %v82_v58 = vpop.permute.xlu1 %81 }
  0x8c   :  { %v77_v61 = vpop.permute.xlu0 %76 }
  0x8f   :  { %v92_v6 = vpop.permute.xlu1 %91 }
  0x90   :  { %v87_v9 = vpop.permute.xlu0 %86 }
  0x94   :  { %v284_v18 = vpop.permute.xlu0 %283 }
 0x117   :  { %v487_v49 = vpop.f32.mrb[0].mxu0 }
 0x118   :  { %v239_v50 = vadd.f32 %v487_v49, %v62_v47  ;;  %v233_v51 = vpop.f32.mrb[1].mxu0 }
 0x119   :  { %v234_v52 = vadd.f32 %v233_v51, %v57_v45 }
 0x11a   :  { %v273_v53 = vmax.f32 %v239_v50, 0.0 }
 0x11b   :  { %v272_v54 = vmax.f32 %v234_v52, 0.0  ;;  %v490_v55 = vpop.f32.mrb[2].mxu0 }
 0x11c   :  { %v249_v56 = vadd.f32 %v490_v55, %v72_v48  ;;  %v243_v57 = vpop.f32.mrb[3].mxu0 }
 0x11d   :  { %v244_v59 = vadd.f32 %v243_v57, %v67_v46  ;;  %v565_v60 = vpack.c.bf16 %v273_v53, %v272_v54 }
 0x11e   :  { %v275_v62 = vmax.f32 %v249_v56, 0.0 }
 0x11f   :  { %v274_v63 = vmax.f32 %v244_v59, 0.0  ;;  %v493_v0 = vpop.f32.mrb[4].mxu0  ;;  %566 = vmatpush3.bf16.msra.mxu1 %v565_v60 }
 0x120   :  { %v259_v1 = vadd.f32 %v493_v0, %v82_v58  ;;  %v253_v2 = vpop.f32.mrb[5].mxu0  ;;  %567 = vmatprep.subr.bf16.mxu1 %v612_v43 }
 0x121   :  { %v568_v3 = vpack.c.bf16 %v275_v62, %v274_v63  ;;  %v254_v4 = vadd.f32 %v253_v2, %v77_v61 }
 0x122   :  { %v277_v5 = vmax.f32 %v259_v1, 0.0 }
 0x123   :  { %v276_v7 = vmax.f32 %v254_v4, 0.0  ;;  %v496_v8 = vpop.f32.mrb[6].mxu0  ;;  %569 = vmatpush3.bf16.msra.mxu1 %v568_v3 }
 0x124   :  { %v269_v10 = vadd.f32 %v496_v8, %v92_v6  ;;  %v263_v11 = vpop.f32.mrb[7].mxu0  ;;  %570 = vmatprep.subr.bf16.mxu1 %v612_v43 }
 0x125   :  { %v571_v12 = vpack.c.bf16 %v277_v5, %v276_v7  ;;  %v264_v13 = vadd.f32 %v263_v11, %v87_v9 }
 0x126   :  { %v279_v14 = vmax.f32 %v269_v10, 0.0 }
 0x127   :  { %v278_v15 = vmax.f32 %v264_v13, 0.0  ;;  %572 = vmatpush3.bf16.msra.mxu1 %v571_v12 }
 0x128   :  { %573 = vmatprep.subr.bf16.mxu1 %v612_v43 }
 0x129   :  { %v574_v16 = vpack.c.bf16 %v279_v14, %v278_v15 }
 0x12b   :  { %575 = vmatpush3.bf16.msra.mxu1 %v574_v16 }
 0x12e   :  { %514 = vmatmul.mubr.msk.f32.vlgmr.msra.gmra.mrb[0].mxu1 %vm286_vm3, %v45_v17 }
 0x201   :  { %v356_v19 = vpop.f32.mrb[0].mxu1 }
 0x202   :  { %v357_v20 = vadd.f32 %v356_v19, %v284_v18  ;;  %v515_v21 = vpop.f32.mrb[1].mxu1 }
 0x204   :  { %v361_v22 = vsel %vm360_vm4, %v357_v20, -inf }
 0x205   :  { %v362_v23 = vrot.slane %v361_v22, 4 }
 0x207   :  { %v363_v24 = vmax.f32 %v361_v22, %v362_v23 }
 0x209   :  { %v364_v25 = vrot.slane %v363_v24, 2 }
 0x20b   :  { %v365_v26 = vmax.f32 %v363_v24, %v364_v25 }
 0x20d   :  { %v366_v27 = vrot.slane %v365_v26, 1 }
 0x20f   :  { %v367_v28 = vmax.f32 %v365_v26, %v366_v27 }
 0x211   :  { %v368_v29 = vsub.f32 %v357_v20, %v367_v28 }
 0x213   :  { %v369_v30 = vmul.f32 1.442695, %v368_v29 }
 0x215   :  { %583 = vpow2.f32 %v369_v30 }
 0x21f   :  { %v584_v31 = vpop.eup %583 }
 0x220   :  { %v371_v32 = vsel %vm360_vm4, %v584_v31, 0.0 }
 0x221   :  { %v372_v33 = vrot.slane %v371_v32, 4 }
 0x223   :  { %v373_v34 = vadd.f32 %v372_v33, %v371_v32 }
 0x225   :  { %v374_v35 = vrot.slane %v373_v34, 2 }
 0x227   :  { %v375_v36 = vadd.f32 %v374_v35, %v373_v34 }
 0x229   :  { %v376_v37 = vrot.slane %v375_v36, 1 }
 0x22b   :  { %v377_v38 = vadd.f32 %v376_v37, %v375_v36 }
 0x22d   :  { %585 = vrcp.f32 %v377_v38 }
 0x237   :  { %v586_v39 = vpop.eup %585 }
 0x238   :  { %v379_v40 = vmul.f32 %v586_v39, %v584_v31 }
 0x23a   :  { %380 = vst [vmem:[#allocation2] sm:$0xf] %v379_v40 }
 0x23b   :  { %598 = shalt.err (!%p595_p4)
}
 0x23c   :  { %s599_s10 = scalar_lea.hbm %s811_s5, 64 }
 0x23d   :  { %p600_p5 = scmp.ne.s32.totalorder %s811_s5, %s599_s10  ;;  %p603_p6 = scmp.lt.u32.totalorder %s599_s10, %s811_s5 }
 0x23f   :  { %p605_p7 = pnand %p603_p6, %p600_p5 }
 0x241   :  { %608 = shalt.err (!%p605_p7)
}
 0x242   :  { %390 = dma.vmem_to_hbm [thread:$0]  %s388_s7, 64, %s811_s5, [#allocation3]  }
 0x243   :  { %609 = dma.done.wait [#allocation3], 64  }
 0x244   :  { %610 = vsyncadd [#allocation3], 4294967232 }
 0x245   :  { %394 = vsyncpa [#allocation3], 1 }

</bundles_post_ra>
